<compile_context>
chip_gen: v7x
topology: tpu7x:2x2x1
jax: 0.10.0
libtpu: 0.0.40
codegen_flags: <defaults>
</compile_context>

<pallas_src>
import math
from functools import partial

import jax
import jax.numpy as jnp
from jax import lax
from jax.experimental import pallas as pl
from jax.experimental.pallas import tpu as pltpu


# ----------------------------- helpers --------------------------------------

def _vmem_limit_bytes():
    # ~75% of physical VMEM with a hard cap: v5e/v6e (128 MiB) -> 96 MiB,
    # v7x (64 MiB) -> 48 MiB.  Falls back to a safe 48 MiB if the query fails.
    try:
        cap = int(getattr(pltpu.get_tpu_info(), "vmem_capacity_bytes",
                          64 * 1024 * 1024))
    except Exception:
        cap = 64 * 1024 * 1024
    return int(min(cap * 3 // 4, 100 * 1024 * 1024))


def _gelu_f32(y):
    # tanh-approximate GELU (EUP-friendly).
    # TODO(synk): HF BERT uses exact erf-GELU; tanh approximation gives small drift.
    return 0.5 * y * (1.0 + jnp.tanh(0.7978845608028654 * (y + 0.044715 * y * y * y)))


def _layernorm_f32(y, g, beta, out_dtype):
    mu = jnp.mean(y, axis=-1, keepdims=True)
    var = jnp.mean((y - mu) ** 2, axis=-1, keepdims=True)
    yn = (y - mu) * lax.rsqrt(var + 1e-12)
    return (yn * g.astype(jnp.float32) + beta.astype(jnp.float32)).astype(out_dtype)


def _split_tile_m(M, tile_m):
    # Pick a token-tile: big enough to amortize per-step overhead, but split a
    # one-step grid in two so both v7x TensorCores get work when possible.
    tm = min(tile_m, M)
    if tm == M and M % 16 == 0 and M >= 16:
        tm = M // 2
    return tm


# ----------------------------- standalone kernels ----------------------------

def _layernorm_kernel(x_ref, g_ref, b_ref, o_ref):
    o_ref[...] = _layernorm_f32(x_ref[...].astype(jnp.float32),
                                g_ref[...], b_ref[...], o_ref.dtype)


def layernorm(x2d, g, b, *, tile_m=512):
    M, H = x2d.shape
    tm = _split_tile_m(M, tile_m)
    return pl.pallas_call(
        _layernorm_kernel,
        out_shape=jax.ShapeDtypeStruct((M, H), x2d.dtype),
        grid=(pl.cdiv(M, tm),),
        in_specs=[
            pl.BlockSpec((tm, H), lambda i: (i, 0)),
            pl.BlockSpec((1, H), lambda i: (0, 0)),
            pl.BlockSpec((1, H), lambda i: (0, 0)),
        ],
        out_specs=pl.BlockSpec((tm, H), lambda i: (i, 0)),
        compiler_params=pltpu.CompilerParams(
            dimension_semantics=("parallel",),
            vmem_limit_bytes=_vmem_limit_bytes()),
    )(x2d, g.reshape(1, H), b.reshape(1, H))


# ------------------- fully-fused encoder layer (1 pallas_call) ---------------

def _encoder_layer_kernel(x_ref, mb_ref,
                          wqkv_ref, bqkv_ref, wo_ref, bo_ref,
                          ln1g_ref, ln1b_ref,
                          w1_ref, b1_ref, w2_ref, b2_ref,
                          ln2g_ref, ln2b_ref,
                          o_ref, *, num_heads, scale):
    x = x_ref[0]                                       # [S, H] bf16 (loaded once)
    S, H = x.shape
    dh = H // num_heads

    # ---- fused QKV projection: one [H, 3H] MXU matmul, f32 accumulation ----
    qkv = jnp.dot(x, wqkv_ref[...], preferred_element_type=jnp.float32)
    qkv = (qkv + bqkv_ref[...].astype(jnp.float32)).astype(x.dtype)   # [S, 3H]

    mbias = mb_ref[0].astype(jnp.float32)              # [1, S] key bias, broadcasts

    # ---- attention, one head at a time: only one [S, S] f32 score block live ----
    head_outs = []
    for h in range(num_heads):
        q = qkv[:, h * dh:(h + 1) * dh]                        # [S, dh]
        k = qkv[:, H + h * dh: H + (h + 1) * dh]               # [S, dh]
        v = qkv[:, 2 * H + h * dh: 2 * H + (h + 1) * dh]       # [S, dh]
        s = lax.dot_general(q, k, (((1,), (1,)), ((), ())),    # q @ k^T, no transpose
                            preferred_element_type=jnp.float32) * scale   # [S, S]
        s = s + mbias
        s = s - jnp.max(s, axis=-1, keepdims=True)
        p = jnp.exp(s)
        denom = jnp.sum(p, axis=-1, keepdims=True)             # [S, 1]
        o_h = jnp.dot(p.astype(x.dtype), v, preferred_element_type=jnp.float32)
        head_outs.append(o_h / denom)                          # exact normalize
    attn = jnp.concatenate(head_outs, axis=-1).astype(x.dtype)  # [S, H]

    # ---- out-projection + residual + LayerNorm (fused epilogue) ----
    y = jnp.dot(attn, wo_ref[...], preferred_element_type=jnp.float32)
    y = y + bo_ref[...].astype(jnp.float32) + x.astype(jnp.float32)
    x1 = _layernorm_f32(y, ln1g_ref[...], ln1b_ref[...], jnp.float32)   # [S, H] f32

    # ---- FFN (w1 + GELU + w2) + residual + LayerNorm; [S, F] stays in VMEM ----
    hmid = jnp.dot(x1.astype(x.dtype), w1_ref[...], preferred_element_type=jnp.float32)
    hmid = _gelu_f32(hmid + b1_ref[...].astype(jnp.float32))
    y2 = jnp.dot(hmid.astype(x.dtype), w2_ref[...], preferred_element_type=jnp.float32)
    y2 = y2 + b2_ref[...].astype(jnp.float32) + x1
    o_ref[0] = _layernorm_f32(y2, ln2g_ref[...], ln2b_ref[...], o_ref.dtype)


def encoder_layer(x, mask_bias, layer, num_heads):
    # x: [B, S, H] bf16; mask_bias: [B, 1, S] f32 (0 keep / -1e9 pad)
    B, S, H = x.shape
    F = layer["w1"].shape[1]
    dh = H // num_heads
    scale = 1.0 / math.sqrt(dh)

    def wspec(shape):
        return pl.BlockSpec(shape, lambda b: (0,) * len(shape))   # resident weights

    return pl.pallas_call(
        partial(_encoder_layer_kernel, num_heads=num_heads, scale=scale),
        out_shape=jax.ShapeDtypeStruct((B, S, H), x.dtype),
        grid=(B,),                                   # one batch element per step
        in_specs=[
            pl.BlockSpec((1, S, H), lambda b: (b, 0, 0)),   # hidden (also residual)
            pl.BlockSpec((1, 1, S), lambda b: (b, 0, 0)),   # mask bias
            wspec((H, 3 * H)), wspec((1, 3 * H)),           # fused QKV
            wspec((H, H)), wspec((1, H)),                   # out-proj
            wspec((1, H)), wspec((1, H)),                   # LN1
            wspec((H, F)), wspec((1, F)),                   # FFN w1
            wspec((F, H)), wspec((1, H)),                   # FFN w2
            wspec((1, H)), wspec((1, H)),                   # LN2
        ],
        out_specs=pl.BlockSpec((1, S, H), lambda b: (b, 0, 0)),
        compiler_params=pltpu.CompilerParams(
            dimension_semantics=("parallel",),
            vmem_limit_bytes=_vmem_limit_bytes()),
    )(x, mask_bias,
      layer["wqkv"], layer["bqkv"].reshape(1, 3 * H),
      layer["wo"], layer["bo"].reshape(1, H),
      layer["ln1_g"].reshape(1, H), layer["ln1_b"].reshape(1, H),
      layer["w1"], layer["b1"].reshape(1, F),
      layer["w2"], layer["b2"].reshape(1, H),
      layer["ln2_g"].reshape(1, H), layer["ln2_b"].reshape(1, H))


# ----------------------------- pooling kernel --------------------------------

def _pool_kernel(h_ref, m_ref, o_ref):
    h = h_ref[...].astype(jnp.float32)              # [bB, S, H]
    m = m_ref[...]                                  # [bB, S] f32, prefix already zeroed
    # masked sum over S as a batched mat-vec (lane-dense [bB, H] output)
    summed = lax.dot_general(m, h, (((1,), (1,)), ((0,), (0,))),
                             preferred_element_type=jnp.float32)      # [bB, H]
    lens = jnp.maximum(jnp.sum(m, axis=1, keepdims=True), 1.0)        # [bB, 1]
    o_ref[...] = (summed / lens).astype(o_ref.dtype)


def masked_mean_pool(hidden, pool_mask):
    # hidden: [B, S, H]; pool_mask: [B, S] f32 with the 4 prefix tokens zeroed.
    B, S, H = hidden.shape
    bB = min(64, B)
    return pl.pallas_call(
        _pool_kernel,
        out_shape=jax.ShapeDtypeStruct((B, H), jnp.float32),
        grid=(pl.cdiv(B, bB),),
        in_specs=[
            pl.BlockSpec((bB, S, H), lambda i: (i, 0, 0)),
            pl.BlockSpec((bB, S), lambda i: (i, 0)),
        ],
        out_specs=pl.BlockSpec((bB, H), lambda i: (i, 0)),
        compiler_params=pltpu.CompilerParams(
            dimension_semantics=("parallel",),
            vmem_limit_bytes=_vmem_limit_bytes()),
    )(hidden, pool_mask.astype(jnp.float32))


# ------------------------- model params / forward ---------------------------

def init_params(key, *, vocab=64, max_pos=32, hidden=64, num_heads=2,
                num_layers=2, ffn=128, dtype=jnp.bfloat16):
    def nrm(k, shape):
        return (0.02 * jax.random.normal(k, shape)).astype(dtype)

    keys = iter(jax.random.split(key, 4 + num_layers * 4))
    params = {
        "num_heads": num_heads,
        "word_emb": nrm(next(keys), (vocab, hidden)),
        "pos_emb": nrm(next(keys), (max_pos, hidden)),
        "type_emb": nrm(next(keys), (2, hidden)),
        "emb_ln_g": jnp.ones((hidden,), dtype),
        "emb_ln_b": jnp.zeros((hidden,), dtype),
        "layers": [],
    }
    for _ in range(num_layers):
        layer = {
            "wqkv": nrm(next(keys), (hidden, 3 * hidden)),   # fused Q/K/V projection
            "bqkv": jnp.zeros((3 * hidden,), dtype),
            "wo": nrm(next(keys), (hidden, hidden)), "bo": jnp.zeros((hidden,), dtype),
            "ln1_g": jnp.ones((hidden,), dtype), "ln1_b": jnp.zeros((hidden,), dtype),
            "w1": nrm(next(keys), (hidden, ffn)), "b1": jnp.zeros((ffn,), dtype),
            "w2": nrm(next(keys), (ffn, hidden)), "b2": jnp.zeros((hidden,), dtype),
            "ln2_g": jnp.ones((hidden,), dtype), "ln2_b": jnp.zeros((hidden,), dtype),
        }
        params["layers"].append(layer)
    return params


def docs_tctcolbert_forward(params, inps):
    input_ids = inps["input_ids"]            # [B, S] int32
    attention_mask = inps["attention_mask"]  # [B, S] int32 (0/1)
    token_type_ids = inps["token_type_ids"]  # [B, S] int32
    B, S = input_ids.shape
    H = params["word_emb"].shape[1]
    nh = params["num_heads"]
    dtype = params["word_emb"].dtype

    # Embedding lookup (gather is XLA glue); embedding LayerNorm is a kernel.
    x = (params["word_emb"][input_ids]
         + params["pos_emb"][:S][None, :, :]
         + params["type_emb"][token_type_ids]).astype(dtype)
    hidden = layernorm(x.reshape(B * S, H),
                       params["emb_ln_g"], params["emb_ln_b"]).reshape(B, S, H)

    mask_bias = ((1.0 - attention_mask.astype(jnp.float32)) * -1e9)[:, None, :]  # [B,1,S]

    # One fused pallas_call per encoder layer (no XLA glue between layers).
    for layer in params["layers"]:
        hidden = encoder_layer(hidden, mask_bias, layer, nh)

    # TCT-ColBERT docs pooling: drop the 4 prefix tokens ('[CLS] [D]') by zeroing
    # their mask entries, then masked mean over the full sequence (same math,
    # (8,128)-friendly tiles, no sublane-misaligned slice).
    pool_mask = (attention_mask.astype(jnp.float32)
                 * (jnp.arange(S) >= 4).astype(jnp.float32)[None, :])
    emb = masked_mean_pool(hidden, pool_mask)
    return {"sentence_embedding": emb}


# ---------------------------------- main ------------------------------------

if __name__ == "__main__":
    B, S, H = 2, 16, 64
    NUM_HEADS, NUM_LAYERS, FFN = 2, 2, 128

    key = jax.random.PRNGKey(0)
    k_params, k_ids = jax.random.split(key)

    params = init_params(k_params, vocab=64, max_pos=S, hidden=H,
                         num_heads=NUM_HEADS, num_layers=NUM_LAYERS, ffn=FFN,
                         dtype=jnp.bfloat16)

    input_ids = jax.random.randint(k_ids, (B, S), 0, 64, dtype=jnp.int32)
    # batch 0: full length; batch 1: 10 real tokens then padding
    attention_mask = jnp.stack([
        jnp.ones((S,), jnp.int32),
        jnp.concatenate([jnp.ones((10,), jnp.int32), jnp.zeros((S - 10,), jnp.int32)]),
    ])
    token_type_ids = jnp.zeros((B, S), jnp.int32)

    inps = {"input_ids": input_ids,
            "attention_mask": attention_mask,
            "token_type_ids": token_type_ids}

    out = docs_tctcolbert_forward(params, inps)
    emb = jax.block_until_ready(out["sentence_embedding"])
    assert emb.shape == (B, H)
    assert bool(jnp.all(jnp.isfinite(emb)))
    print("KERNEL_OK")
</pallas_src>

<mosaic_0001>
module attributes {stable_mosaic.version = 11 : i64} {
  func.func @_layernorm_kernel(%arg0: i32, %arg1: memref<16x64xbf16, #tpu.memory_space<vmem>>, %arg2: memref<1x64xbf16, #tpu.memory_space<vmem>>, %arg3: memref<1x64xbf16, #tpu.memory_space<vmem>>, %arg4: memref<16x64xbf16, #tpu.memory_space<vmem>>) attributes {dimension_semantics = [#tpu.dimension_semantics<parallel>], iteration_bounds = array<i64: 2>, scalar_prefetch = 0 : i64, scratch_operands = 0 : i64, tpu.core_type = #tpu.core_type<tc>, window_params = [{transform_indices = @transform_0, window_bounds = array<i64: 16, 64>}, {pipeline_mode = #tpu.pipeline_mode<synchronous>, transform_indices = @transform_1, window_bounds = array<i64: 1, 64>}, {pipeline_mode = #tpu.pipeline_mode<synchronous>, transform_indices = @transform_2, window_bounds = array<i64: 1, 64>}, {transform_indices = @transform_3, window_bounds = array<i64: 16, 64>}]} {
    %c0 = arith.constant 0 : index
    %c0_0 = arith.constant 0 : index
    %0 = vector.load %arg1[%c0, %c0_0] : memref<16x64xbf16, #tpu.memory_space<vmem>>, vector<16x64xbf16>
    %1 = arith.extf %0 : vector<16x64xbf16> to vector<16x64xf32>
    %c0_1 = arith.constant 0 : index
    %c0_2 = arith.constant 0 : index
    %2 = vector.load %arg2[%c0_1, %c0_2] : memref<1x64xbf16, #tpu.memory_space<vmem>>, vector<1x64xbf16>
    %c0_3 = arith.constant 0 : index
    %c0_4 = arith.constant 0 : index
    %3 = vector.load %arg3[%c0_3, %c0_4] : memref<1x64xbf16, #tpu.memory_space<vmem>>, vector<1x64xbf16>
    %cst = arith.constant dense<0.000000e+00> : vector<16xf32>
    %4 = vector.multi_reduction <add>, %1, %cst [1] : vector<16x64xf32> to vector<16xf32>
    %5 = vector.shape_cast %4 : vector<16xf32> to vector<16x1xf32>
    %cst_5 = arith.constant 6.400000e+01 : f32
    %6 = vector.broadcast %cst_5 : f32 to vector<16x1xf32>
    %7 = arith.divf %5, %6 : vector<16x1xf32>
    %8 = vector.broadcast %7 : vector<16x1xf32> to vector<16x64xf32>
    %9 = arith.subf %1, %8 : vector<16x64xf32>
    %10 = arith.mulf %9, %9 : vector<16x64xf32>
    %cst_6 = arith.constant dense<0.000000e+00> : vector<16xf32>
    %11 = vector.multi_reduction <add>, %10, %cst_6 [1] : vector<16x64xf32> to vector<16xf32>
    %12 = vector.shape_cast %11 : vector<16xf32> to vector<16x1xf32>
    %cst_7 = arith.constant 6.400000e+01 : f32
    %13 = vector.broadcast %cst_7 : f32 to vector<16x1xf32>
    %14 = arith.divf %12, %13 : vector<16x1xf32>
    %15 = vector.broadcast %7 : vector<16x1xf32> to vector<16x64xf32>
    %16 = arith.subf %1, %15 : vector<16x64xf32>
    %cst_8 = arith.constant 9.99999996E-13 : f32
    %17 = vector.broadcast %cst_8 : f32 to vector<16x1xf32>
    %18 = arith.addf %14, %17 : vector<16x1xf32>
    %19 = math.rsqrt %18 : vector<16x1xf32>
    %20 = vector.broadcast %19 : vector<16x1xf32> to vector<16x64xf32>
    %21 = arith.mulf %16, %20 : vector<16x64xf32>
    %22 = arith.extf %2 : vector<1x64xbf16> to vector<1x64xf32>
    %23 = vector.broadcast %22 : vector<1x64xf32> to vector<16x64xf32>
    %24 = arith.mulf %21, %23 : vector<16x64xf32>
    %25 = arith.extf %3 : vector<1x64xbf16> to vector<1x64xf32>
    %26 = vector.broadcast %25 : vector<1x64xf32> to vector<16x64xf32>
    %27 = arith.addf %24, %26 : vector<16x64xf32>
    %28 = arith.truncf %27 : vector<16x64xf32> to vector<16x64xbf16>
    %c0_9 = arith.constant 0 : index
    %c0_10 = arith.constant 0 : index
    %29 = vector.load %arg4[%c0_9, %c0_10] : memref<16x64xbf16, #tpu.memory_space<vmem>>, vector<16x64xbf16>
    tpu.vector_store %arg4[%c0_9, %c0_10], %28 {strides = array<i32>} : memref<16x64xbf16, #tpu.memory_space<vmem>>, vector<16x64xbf16>,
    return
  }
  func.func @transform_0(%arg0: i32) -> (i32, i32) {
    %c0_i32 = arith.constant 0 : i32
    %c0_i32_0 = arith.constant 0 : i32
    return %arg0, %c0_i32 : i32, i32
  }
  func.func @transform_1(%arg0: i32) -> (i32, i32) {
    %c0_i32 = arith.constant 0 : i32
    %c0_i32_0 = arith.constant 0 : i32
    %c0_i32_1 = arith.constant 0 : i32
    return %c0_i32, %c0_i32_0 : i32, i32
  }
  func.func @transform_2(%arg0: i32) -> (i32, i32) {
    %c0_i32 = arith.constant 0 : i32
    %c0_i32_0 = arith.constant 0 : i32
    %c0_i32_1 = arith.constant 0 : i32
    return %c0_i32, %c0_i32_0 : i32, i32
  }
  func.func @transform_3(%arg0: i32) -> (i32, i32) {
    %c0_i32 = arith.constant 0 : i32
    %c0_i32_0 = arith.constant 0 : i32
    return %arg0, %c0_i32 : i32, i32
  }
}

</mosaic_0001>

<bundles_post_ra>
// kernel: tpu_custom_call.1
= control target key start
LH: loop header
LB: loop body
LE: loop exit
PB: predicated region body
PF: predicated region fallthrough
CT: control target
= control target key end

     0   :  { %8 = vsyncpa [#allocation3], 0  ;;  %s715_s0 = inlined_call_operand.hbm [shape: bf16[32,64], index: 0, kind: input, shape index: {}]   ;;  %s716_s1 = inlined_call_operand.vmem [shape: bf16[1,64], index: 1, kind: input, shape index: {}]   ;;  %s717_s2 = inlined_call_operand.vmem [shape: bf16[1,64], index: 2, kind: input, shape index: {}]   ;;  %s718_s3 = inlined_call_operand.hbm [shape: bf16[32,64], index: 3, kind: output, shape index: {}]  }
   0x1   :  { %10 = vsyncpa [#allocation3 + $0x1], 0 }
   0x2   :  { %11 = vsyncpa [#allocation4], 0 }
   0x3   :  { %13 = vsyncpa [#allocation4 + $0x1], 0  ;;  %s539_s12 = smov 0   ;;  %s541_s13 = smov 0  }
   0x4   :  { %s543_s14 = smov 0   ;;  %s545_s15 = smov 0  }
   0x5 LB: > { %s560_s16 = sadd.s32 4294967295, %s511_s15   ;;  %s337_s17 = sadd.s32 4294967294, %s511_s15   ;;  %s511_s15 = sphi %s545_s15, %s731_s15   ;;  %s507_s14 = sphi %s543_s14, %s730_s14   ;;  %s503_s13 = sphi %s541_s13, %s729_s13   ;;  %s499_s12 = sphi %s539_s12, %s728_s12  }
   0x6   : > { %s564_s18 = sadd.s32 1, %s511_s15   ;;  %s26_s19 = sadd.s32 1, %s507_s14 }
   0x7   : > { %s23_s20 = ssub.s32 %s511_s15, %s564_s18  ;;  %p33_p0 = scmp.ne.s32.totalorder %s507_s14, %s503_s13 }
   0x8   : > { %p24_p1 = scmp.eq.s32.totalorder %s23_s20, 0  ;;  %p34_p2 = scmp.eq.s32.totalorder %s511_s15, 0 }
   0x9   : > { %p39_p3 = scmp.ne.s32.totalorder %s503_s13, %s499_s12  ;;  %p40_p4 = scmp.eq.s32.totalorder %s560_s16, 0 }
   0xa   : > { %s576_s21 = scalar_select %p24_p1, %s507_s14, %s26_s19  }
   0xb   : > { %p578_p5 = por %p34_p2, %p33_p0  ;;  %p582_p6 = por %p40_p4, %p39_p3 }
   0xc   : > { %p105_p7 = scmp.eq.s32.totalorder %s560_s16, 1  ;;  %p111_p8 = scmp.eq.s32.totalorder %s337_s17, 1 }
   0xd   : > { %p373_p10 = scmp.lt.s32.totalorder %s511_s15, 2  ;;  %s137_s26 = sand.u32 1, %s507_s14  }
   0xe   : > { %p589_p11 = por %p105_p7, %p33_p0  ;;  %p593_p12 = por %p111_p8, %p39_p3 }
   0xf   : > { %s353_s27 = sshll.u32 %s511_s15, 7  ;;  %s340_s28 = sshll.u32 %s137_s26, 3 }
  0x10   : > { %s722_s24 = scalar_select %p589_p11, 1, 0 }
  0x11   : > { %s723_s25 = scalar_select %p593_p12, 1, 0 }
  0x12   : > { %s602_s4 = scalar_lea.hbm %s715_s0, %s353_s27  ;;  %s141_s5 = scalar_lea.vmem [#allocation2], %s340_s28 }
  0x13   : > { %s148_s6 = sshll.u32 %s141_s5, 4  ;;  %p606_p13 = pnand %p373_p10, %p578_p5  ;;  %s610_s6 = int_to_ptr.vmem [resolvable:$true] %s148_s6 }
  0x14   : > { %s612_s8 = scalar_lea.sflag [#allocation3], %s137_s26  ;;  %s415_s9 = scalar_lea.hbm %s602_s4, 128 }
  0x15   : > { %p416_p0 = scmp.ne.s32.totalorder %s602_s4, %s415_s9  ;;  %p417_p1 = pneg %p606_p13 }
  0x16   : > { %s420_s17 = scalar_lea.hbm %s715_s0, 256  ;;  %p421_p4 = scmp.lt.u32.totalorder %s602_s4, %s715_s0 }
  0x17   : > { %p418_p2 = pnand %p417_p1, %p416_p0  ;;  %p422_p5 = scmp.lt.u32.totalorder %s420_s17, %s415_s9 }
  0x18   : > { %p424_p8 = scmp.lt.u32.totalorder %s415_s9, %s602_s4 }
  0x19   : > { %p419_p3 = pneg %p418_p2  ;;  %p423_p7 = por %p422_p5, %p421_p4 }
  0x1b   : > { %p425_p10 = por %p424_p8, %p423_p7 }
  0x1d   : > { %p426_p9 = pnand %p425_p10, %p419_p3 }
  0x1f   : > { %429 = shalt.err (!%p426_p9)
}
  0x20   : > { %s430_s22 = scalar_lea.vmem %s610_s6, 128  ;;  %s513_s26 = smov [#allocation2]  }
  0x21   : > { %p431_p0 = scmp.ne.s32.totalorder %s610_s6, %s430_s22  ;;  %s435_s27 = sshll.u32 %s513_s26, 4  ;;  %s436_s27 = int_to_ptr.vmem [resolvable:$false] %s435_s27 }
  0x22   : > { %s437_s28 = scalar_lea.vmem %s436_s27, 256  ;;  %p438_p11 = scmp.lt.s32.totalorder %s610_s6, %s436_s27 }
  0x23   : > { %p433_p2 = pnand %p431_p0, %p417_p1  ;;  %p439_p4 = scmp.lt.s32.totalorder %s437_s28, %s430_s22 }
  0x25   : > { %p434_p12 = pneg %p433_p2  ;;  %p440_p5 = por %p439_p4, %p438_p11 }
  0x27   : > { %p441_p7 = pnand %p440_p5, %p434_p12 }
  0x29   : > { %444 = shalt.err (!%p441_p7)
}
  0x2a   : > { %s514_s29 = smov 64   ;;  %s515_s30 = smov 4  }
  0x2b   : > { %368 = dma.hbm_to_vmem [thread:$0]  (!%p606_p13), %s602_s4, 128, %s610_s6, %s612_s8, %s514_s29, %s514_s29, %s515_s30  }
  0x2c   : > { %p343_p9 = scmp.ge.s32.totalorder %s511_s15, 1  ;;  %p156_p1 = scmp.lt.s32.totalorder %s511_s15, 3 }
  0x2e   : > { %p157_p3 = pnand %p343_p9, %p156_p1 }
  0x2f   : > { %s643_s5 = sand.u32 (!%p157_p3), 1, %s503_s13  }
  0x30   : > { %160 = sbr.rel (%p157_p3) target bundleno = 393 (0x189), region = 32  ;;  %s344_s9 = sshll.u32 (!%p157_p3), %s643_s5, 3 }
  0x31   : > { %s163_s10 = scalar_lea.sflag (!%p157_p3), [#allocation3], %s643_s5  ;;  %s166_s11 = scalar_lea.vmem (!%p157_p3), [#allocation2], %s344_s9 }
  0x37   : > { %490 = dma.done.wait (%p582_p6), %s163_s10, 128  }
  0x38   : > { %492 = vsyncadd (%p582_p6), %s163_s10, 4294967168  ;;  %v358_v0 = vld [vmem:[%s166_s11] sm:$0xff]   ;;  %vm197_vm0 = vcmask 523264   ;;  %v226_v17 = vlaneseq  ;;  %vm247_vm1 = vcmask 519168   ;;  %s356_s8 = sshll.u32 %s560_s16, 7  ;;  %s188_s17 = scalar_lea.vmem [#allocation5], %s344_s9 }
  0x39   : > { %v359_v1 = vunpack.c.l.bf16 %v358_v0  ;;  %v360_v2 = vunpack.c.h.bf16 %v358_v0  ;;  %v195_v22 = vld [vmem:[%s716_s1] sm:$0x1]  ;;  %s264_s19 = sshll.u32 %s188_s17, 4  ;;  %s669_s26 = scalar_lea.hbm %s718_s3, %s356_s8  ;;  %s671_s19 = int_to_ptr.vmem [resolvable:$true] %s264_s19 }
  0x3a   : > { %v227_v21 = vshrl.u32 %v226_v17, 7  ;;  %v196_v24 = vld [vmem:[%s717_s2] sm:$0x1]  ;;  %v225_v25 = vunpack.c.l.bf16 %v195_v22  ;;  %s251_s27 = scalar_lea.sflag [#allocation4], %s643_s5  ;;  %s445_s28 = scalar_lea.vmem %s671_s19, 128 }
  0x3b   : > { %v198_v3 = vsel %vm197_vm0, %v359_v1, 0.0  ;;  %v201_v4 = vsel %vm197_vm0, %v360_v2, 0.0  ;;  %v232_v27 = vunpack.c.l.bf16 %v196_v24  ;;  %p446_p6 = scmp.ne.s32.totalorder %s671_s19, %s445_s28  ;;  %p725_p11 = scmp.ne.s32.totalorder %s722_s24, 0 }
  0x3c   : > { %199 = vadd.xlane.f32.xlu0 %v198_v3  ;;  %v228_v26 = vsub.s32 0, %v227_v21  ;;  %s516_s16 = smov [#allocation5]  }
  0x3d   : > { %p447_p12 = pnand %p446_p6, %p725_p11  ;;  %s449_s29 = sshll.u32 %s516_s16, 4  ;;  %s450_s29 = int_to_ptr.vmem [resolvable:$false] %s449_s29 }
  0x3e   : > { %v229_v28 = vrot.slane %v225_v25, %v228_v26  ;;  %v236_v30 = vrot.slane %v232_v27, %v228_v26  ;;  %s451_s30 = scalar_lea.vmem %s450_s29, 256  ;;  %p452_p8 = scmp.lt.s32.totalorder %s671_s19, %s450_s29 }
  0x3f   : > { %p448_p13 = pneg %p447_p12  ;;  %p453_p10 = scmp.lt.s32.totalorder %s451_s30, %s445_s28 }
  0x40   : > { %202 = vadd.xlane.f32.xlu0 %v201_v4 }
  0x41   : > { %p454_p0 = por %p453_p10, %p452_p8 }
  0x43   : > { %p455_p2 = pnand %p454_p0, %p448_p13 }
  0xc9   : > { %v200_v5 = vpop.xlane.xlu0 %199 }
  0xca   : > { %v205_v6 = vmul.f32 0.015625, %v200_v5 }
  0xcc   : > { %v207_v7 = vsub.f32 %v359_v1, %v205_v6 }
  0xcd   : > { %v203_v8 = vpop.xlane.xlu0 %202 }
  0xce   : > { %v206_v9 = vmul.f32 0.015625, %v203_v8  ;;  %v209_v10 = vmul.f32 %v207_v7, %v207_v7 }
  0xd0   : > { %v208_v11 = vsub.f32 %v360_v2, %v206_v9  ;;  %v211_v12 = vsel %vm197_vm0, %v209_v10, 0.0 }
  0xd1   : > { %212 = vadd.xlane.f32.xlu1 %v211_v12 }
  0xd2   : > { %v210_v13 = vmul.f32 %v208_v11, %v208_v11 }
  0xd4   : > { %v214_v14 = vsel %vm197_vm0, %v210_v13, 0.0 }
  0xd5   : > { %215 = vadd.xlane.f32.xlu1 %v214_v14 }
 0x15e   : > { %v213_v15 = vpop.xlane.xlu1 %212 }
 0x15f   : > { %v217_v16 = vmul.f32 0.015625, %v213_v15 }
 0x161   : > { %v219_v18 = vadd.f32 1e-12, %v217_v16 }
 0x162   : > { %v216_v19 = vpop.xlane.xlu1 %215 }
 0x163   : > { %411 = vrsqrt.f32 %v219_v18  ;;  %v218_v20 = vmul.f32 0.015625, %v216_v19 }
 0x165   : > { %v220_v23 = vadd.f32 1e-12, %v218_v20 }
 0x167   : > { %413 = vrsqrt.f32 %v220_v23 }
 0x16d   : > { %v412_v29 = vpop.eup %411 }
 0x16e   : > { %v223_v31 = vmul.f32 %v412_v29, %v207_v7 }
 0x170   : > { %v230_v32 = vmul.f32 %v229_v28, %v223_v31 }
 0x171   : > { %v414_v33 = vpop.eup %413 }
 0x172   : > { %v237_v34 = vadd.f32 %v236_v30, %v230_v32  ;;  %v224_v35 = vmul.f32 %v414_v33, %v208_v11 }
 0x174   : > { %v354_v36 = vpack.c.bf16 %v237_v34, %v237_v34  ;;  %v231_v37 = vmul.f32 %v229_v28, %v224_v35 }
 0x176   : > { %v238_v38 = vadd.f32 %v236_v30, %v231_v37  ;;  %248 = vst.msk [vmem:[%s188_s17] sm:$0xf] %vm247_vm1, %v354_v36 }
 0x178   : > { %v355_v39 = vpack.c.bf16 %v238_v38, %v238_v38 }
 0x17a   : > { %249 = vst.msk [vmem:[%s188_s17 + $0x4] sm:$0xf] %vm247_vm1, %v355_v39 }
 0x17b   : > { %458 = shalt.err (!%p455_p2)
}
 0x17c   : > { %s459_s9 = scalar_lea.hbm %s669_s26, 128  ;;  %s463_s23 = scalar_lea.hbm %s718_s3, 256 }
 0x17d   : > { %p460_p4 = scmp.ne.s32.totalorder %s669_s26, %s459_s9  ;;  %p464_p9 = scmp.lt.u32.totalorder %s669_s26, %s718_s3 }
 0x17e   : > { %p465_p1 = scmp.lt.u32.totalorder %s463_s23, %s459_s9  ;;  %p467_p6 = scmp.lt.u32.totalorder %s459_s9, %s669_s26 }
 0x17f   : > { %p461_p5 = pnand %p460_p4, %p725_p11 }
 0x180   : > { %p466_p3 = por %p465_p1, %p464_p9 }
 0x181   : > { %p462_p7 = pneg %p461_p5 }
 0x182   : > { %p468_p12 = por %p467_p6, %p466_p3 }
 0x184   : > { %p469_p13 = pnand %p468_p12, %p462_p7 }
 0x186   : > { %472 = shalt.err (!%p469_p13)
}
 0x187   : > { %s517_s7 = smov 64   ;;  %s518_s8 = smov 4  }
 0x188   : > { %363 = dma.vmem_to_hbm [thread:$0]  (%p725_p11), %s671_s19, 128, %s669_s26, %s251_s27, %s517_s7, %s517_s7, %s518_s8  }
 0x189 PF: > { %s279_s17 = sand.u32 1, %s499_s12   ;;  %p726_p8 = scmp.ne.s32.totalorder %s723_s25, 0 }
 0x18a   : > { %p727_p10 = scmp.ge.s32.totalorder %s511_s15, 2  ;;  %s280_s20 = scalar_lea.sflag [#allocation4], %s279_s17 }
 0x18c   : > { %p370_p0 = pnand %p727_p10, %p726_p8 }
 0x18e   : > { %494 = dma.done.wait (!%p370_p0), %s280_s20, 128  }
 0x18f   : > { %496 = vsyncadd (!%p370_p0), %s280_s20, 4294967168  ;;  %p16_p2 = scmp.ge.s32.totalorder %s564_s18, 4   ;;  %s728_s12 = smov %s503_s13 }
 0x190   : > { %s729_s13 = smov %s507_s14  ;;  %s730_s14 = smov %s576_s21 }
 0x191   : > { %s731_s15 = smov %s564_s18  ;;  %18 = sbr.rel (!%p16_p2) target bundleno = 5 (0x5), region = 77 }
 0x198   :  { %285 = vsyncpa [#allocation3], 1 }
 0x199   :  { %287 = vsyncpa [#allocation3 + $0x1], 1 }
 0x19a   :  { %288 = vsyncpa [#allocation4], 1 }
 0x19b   :  { %290 = vsyncpa [#allocation4 + $0x1], 1 }

</bundles_post_ra>
